<compile_context>
chip_gen: v7x
topology: tpu7x:2x2x1
jax: 0.10.0
libtpu: 0.0.40
codegen_flags: <defaults>
</compile_context>

<pallas_src>
import numpy as np
import jax
import jax.numpy as jnp
from jax import lax
from jax.experimental import pallas as pl
from jax.experimental.pallas import tpu as pltpu


# ---------------- constellation (Sionna QAM, Gray labeling) -----------------
def _pam_gray(b):
    if len(b) > 1:
        return (1 - 2 * b[0]) * (2 ** len(b[1:]) - _pam_gray(b[1:]))
    return 1 - 2 * b[0]


def make_qam(num_bits_per_symbol, normalize=True):
    assert num_bits_per_symbol % 2 == 0, "QAM requires an even number of bits/symbol"
    q = 2 ** num_bits_per_symbol
    c = np.zeros(q, dtype=np.complex64)
    for i in range(q):
        b = np.array(list(np.binary_repr(i, num_bits_per_symbol)), dtype=np.int16)
        c[i] = _pam_gray(b[0::2]) + 1j * _pam_gray(b[1::2])
    if normalize:
        n = num_bits_per_symbol // 2
        qam_var = 1 / (2 ** (n - 2)) * np.sum(
            np.linspace(1, 2 ** n - 1, 2 ** (n - 1)) ** 2)
        c = c / np.sqrt(qam_var)
    return c.astype(np.complex64)


def _qam_scale(num_bits_per_symbol):
    n = num_bits_per_symbol // 2
    qam_var = 1 / (2 ** (n - 2)) * np.sum(
        np.linspace(1, 2 ** n - 1, 2 ** (n - 1)) ** 2)
    return float(1.0 / np.sqrt(qam_var))


def _round_up(x, m):
    return ((x + m - 1) // m) * m


def _cdiv(a, b):
    return -(-a // b)


# ------------------------------ Pallas kernel --------------------------------
def _make_symbol_kernel(K, scale, with_idx):
    """Kernel factory. All constants (bit shifts, normalization) are baked in."""
    mask = (1 << K) - 1
    real_shifts = [K - 1 - k for k in range(0, K, 2)]   # bits driving real axis (MSB first)
    imag_shifts = [K - 1 - k for k in range(1, K, 2)]   # bits driving imag axis (MSB first)

    def _pam(v, shifts):
        # Gray-coded PAM, MSB first, fully unrolled VPU elementwise math:
        #   pam(b) = (1-2*b0) * (2^{n-1} - pam(b1..)) ; pam([b]) = 1-2*b
        val = (1 - 2 * ((v >> shifts[-1]) & 1)).astype(jnp.float32)   # [TR, 128]
        level = 1
        for sh in reversed(shifts[:-1]):
            s = (1 - 2 * ((v >> sh) & 1)).astype(jnp.float32)
            val = s * (float(2 ** level) - val)
            level += 1
        return val

    def _compute(idx_ref):
        # int8 storage of the packed index; mask after widening handles K=8.
        v = idx_ref[...].astype(jnp.int32) & mask                     # [TR, 128]
        real = _pam(v, real_shifts) * scale
        imag = _pam(v, imag_shifts) * scale
        return real, imag, v

    if with_idx:
        def kernel(idx_ref, sym_ref, iout_ref):
            real, imag, v = _compute(idx_ref)
            sym_ref[0, :, :] = real        # dense plane stores, no concat
            sym_ref[1, :, :] = imag
            iout_ref[...] = v              # index output is a free cast of the input
        return kernel

    def kernel(idx_ref, sym_ref):
        real, imag, _ = _compute(idx_ref)
        sym_ref[0, :, :] = real
        sym_ref[1, :, :] = imag
    return kernel


# -------------------------------- wrapper -------------------------------------
def symbol_source(shape, num_bits_per_symbol=4,
                  return_indices=False, return_bits=False):
    shape = tuple(int(s) for s in shape)
    K = int(num_bits_per_symbol)
    assert K % 2 == 0, "QAM requires an even number of bits per symbol"

    # BinarySource semantics: numpy default_rng(12345) regardless of seed.
    rng = np.random.default_rng(seed=12345)
    bits_np = rng.integers(low=0, high=2, size=shape + (K,), dtype=np.int32)
    N = int(np.prod(shape))

    # Pack the K MSB-first bits of each symbol into one integer = symbol index.
    pw = (1 << np.arange(K - 1, -1, -1)).astype(np.int64)
    idx_np = (bits_np.reshape(N, K).astype(np.int64) * pw).sum(-1)
    host_dtype = np.int8 if K <= 8 else np.int32    # 1 byte/symbol for QAM<=256

    # Lane-dense [rows, 128] layout; tile along rows (sublane axis).
    LANES = 128
    R = max(_cdiv(N, LANES), 1)
    R32 = _round_up(R, 32)                 # int8 sublane tile is (32, 128)
    TR_MAX = 2048                          # ~2-3 MB useful bytes / grid step
    if R32 <= 32:
        TR = 32
    elif R32 <= 2 * TR_MAX:
        TR = _round_up(_cdiv(R32, 2), 32)  # >=2 steps so v7x's 2 TCs both work
    else:
        TR = TR_MAX
    Rpad = _round_up(R32, TR)

    buf = np.zeros(Rpad * LANES, dtype=host_dtype)
    buf[:N] = idx_np.astype(host_dtype)
    idx_dev = jnp.asarray(buf.reshape(Rpad, LANES))

    scale = _qam_scale(K)
    kernel = _make_symbol_kernel(K, scale, return_indices)

    grid = (Rpad // TR,)
    in_specs = [pl.BlockSpec((TR, LANES), lambda i: (i, 0))]
    sym_spec = pl.BlockSpec((2, TR, LANES), lambda i: (0, i, 0))

    if return_indices:
        out_shape = (jax.ShapeDtypeStruct((2, Rpad, LANES), jnp.float32),
                     jax.ShapeDtypeStruct((Rpad, LANES), jnp.int32))
        out_specs = (sym_spec, pl.BlockSpec((TR, LANES), lambda i: (i, 0)))
    else:
        out_shape = jax.ShapeDtypeStruct((2, Rpad, LANES), jnp.float32)
        out_specs = sym_spec

    call = pl.pallas_call(
        kernel,
        out_shape=out_shape,
        grid_spec=pltpu.PrefetchScalarGridSpec(
            num_scalar_prefetch=0,
            grid=grid,
            in_specs=in_specs,
            out_specs=out_specs),
        compiler_params=pltpu.CompilerParams(
            dimension_semantics=("parallel",)),
    )

    if return_indices:
        sym, idx_out = call(idx_dev)
    else:
        sym = call(idx_dev)

    # Planar real/imag -> complex64 (single XLA elementwise op; Pallas kernels
    # cannot store complex and bitcast-to-complex is disallowed by XLA).
    re = sym[0].reshape(-1)[:N]
    im = sym[1].reshape(-1)[:N]
    symbols = lax.complex(re, im).reshape(shape)

    if not (return_indices or return_bits):
        return symbols

    result = [symbols]
    if return_indices:
        result.append(idx_out.reshape(-1)[:N].reshape(shape).astype(jnp.int32))
    if return_bits:
        # Reference returns the float bit labels produced by BinarySource.
        # Reconstruct them on device from the packed byte stream (avoids a
        # 4*K*N-byte host->device transfer).
        flat = idx_dev.reshape(-1)[:N].astype(jnp.int32) & ((1 << K) - 1)
        shifts = jnp.arange(K - 1, -1, -1, dtype=jnp.int32)
        bits = ((flat[:, None] >> shifts) & 1).astype(jnp.float32)
        result.append(bits.reshape(shape + (K,)))
    return result


if __name__ == "__main__":
    # jax.random.PRNGKey(0) only fixes the "desired output shape" side of the
    # example; the module's randomness is a fixed numpy seed (12345) by design.
    _ = jax.random.PRNGKey(0)
    out_shape = [2, 4, 16]           # desired symbol-tensor shape
    K = 4                            # QAM16

    symbols, indices, bits = symbol_source(out_shape, num_bits_per_symbol=K,
                                           return_indices=True,
                                           return_bits=True)
    symbols = jax.block_until_ready(symbols)
    indices = jax.block_until_ready(indices)
    bits = jax.block_until_ready(bits)

    # second kernel variant (no index output / no index HBM writeback)
    symbols_only = jax.block_until_ready(
        symbol_source(out_shape, num_bits_per_symbol=K))

    # numpy reference check (same bit stream, same constellation)
    rng = np.random.default_rng(seed=12345)
    b_ref = rng.integers(0, 2, size=tuple(out_shape) + (K,), dtype=np.int32)
    pw = 2 ** np.arange(K - 1, -1, -1)
    idx_ref = (b_ref * pw).sum(-1)
    sym_ref = make_qam(K)[idx_ref]
    assert np.array_equal(np.asarray(indices), idx_ref.astype(np.int32))
    assert np.allclose(np.asarray(symbols), sym_ref, atol=1e-6)
    assert np.allclose(np.asarray(symbols_only), sym_ref, atol=1e-6)
    assert np.array_equal(np.asarray(bits), b_ref.astype(np.float32))
    assert symbols.dtype == jnp.complex64 and indices.dtype == jnp.int32

    print("KERNEL_OK")
</pallas_src>

<mosaic_0001>
module attributes {stable_mosaic.version = 11 : i64} {
  func.func @kernel(%arg0: i32, %arg1: memref<32x128xi8, #tpu.memory_space<vmem>>, %arg2: memref<2x32x128xf32, #tpu.memory_space<vmem>>, %arg3: memref<32x128xi32, #tpu.memory_space<vmem>>) attributes {dimension_semantics = [#tpu.dimension_semantics<parallel>], iteration_bounds = array<i64: 1>, scalar_prefetch = 0 : i64, scratch_operands = 0 : i64, tpu.core_type = #tpu.core_type<tc>, window_params = [{transform_indices = @transform_0, window_bounds = array<i64: 32, 128>}, {transform_indices = @transform_1, window_bounds = array<i64: 2, 32, 128>}, {transform_indices = @transform_2, window_bounds = array<i64: 32, 128>}]} {
    %c0 = arith.constant 0 : index
    %c0_0 = arith.constant 0 : index
    %0 = vector.load %arg1[%c0, %c0_0] : memref<32x128xi8, #tpu.memory_space<vmem>>, vector<32x128xi8>
    %1 = arith.extsi %0 : vector<32x128xi8> to vector<32x128xi32>
    %c15_i32 = arith.constant 15 : i32
    %2 = vector.broadcast %c15_i32 : i32 to vector<32x128xi32>
    %3 = arith.andi %1, %2 : vector<32x128xi32>
    %c1_i32 = arith.constant 1 : i32
    %4 = vector.broadcast %c1_i32 : i32 to vector<32x128xi32>
    %5 = arith.shrsi %3, %4 : vector<32x128xi32>
    %c1_i32_1 = arith.constant 1 : i32
    %6 = vector.broadcast %c1_i32_1 : i32 to vector<32x128xi32>
    %7 = arith.andi %5, %6 : vector<32x128xi32>
    %c2_i32 = arith.constant 2 : i32
    %8 = vector.broadcast %c2_i32 : i32 to vector<32x128xi32>
    %9 = arith.muli %8, %7 : vector<32x128xi32>
    %c1_i32_2 = arith.constant 1 : i32
    %10 = vector.broadcast %c1_i32_2 : i32 to vector<32x128xi32>
    %11 = arith.subi %10, %9 : vector<32x128xi32>
    %12 = arith.sitofp %11 : vector<32x128xi32> to vector<32x128xf32>
    %c3_i32 = arith.constant 3 : i32
    %13 = vector.broadcast %c3_i32 : i32 to vector<32x128xi32>
    %14 = arith.shrsi %3, %13 : vector<32x128xi32>
    %c1_i32_3 = arith.constant 1 : i32
    %15 = vector.broadcast %c1_i32_3 : i32 to vector<32x128xi32>
    %16 = arith.andi %14, %15 : vector<32x128xi32>
    %c2_i32_4 = arith.constant 2 : i32
    %17 = vector.broadcast %c2_i32_4 : i32 to vector<32x128xi32>
    %18 = arith.muli %17, %16 : vector<32x128xi32>
    %c1_i32_5 = arith.constant 1 : i32
    %19 = vector.broadcast %c1_i32_5 : i32 to vector<32x128xi32>
    %20 = arith.subi %19, %18 : vector<32x128xi32>
    %21 = arith.sitofp %20 : vector<32x128xi32> to vector<32x128xf32>
    %cst = arith.constant 2.000000e+00 : f32
    %22 = vector.broadcast %cst : f32 to vector<32x128xf32>
    %23 = arith.subf %22, %12 : vector<32x128xf32>
    %24 = arith.mulf %21, %23 : vector<32x128xf32>
    %cst_6 = arith.constant 0.316227764 : f32
    %25 = vector.broadcast %cst_6 : f32 to vector<32x128xf32>
    %26 = arith.mulf %24, %25 : vector<32x128xf32>
    %c0_i32 = arith.constant 0 : i32
    %27 = vector.broadcast %c0_i32 : i32 to vector<32x128xi32>
    %28 = arith.shrsi %3, %27 : vector<32x128xi32>
    %c1_i32_7 = arith.constant 1 : i32
    %29 = vector.broadcast %c1_i32_7 : i32 to vector<32x128xi32>
    %30 = arith.andi %28, %29 : vector<32x128xi32>
    %c2_i32_8 = arith.constant 2 : i32
    %31 = vector.broadcast %c2_i32_8 : i32 to vector<32x128xi32>
    %32 = arith.muli %31, %30 : vector<32x128xi32>
    %c1_i32_9 = arith.constant 1 : i32
    %33 = vector.broadcast %c1_i32_9 : i32 to vector<32x128xi32>
    %34 = arith.subi %33, %32 : vector<32x128xi32>
    %35 = arith.sitofp %34 : vector<32x128xi32> to vector<32x128xf32>
    %c2_i32_10 = arith.constant 2 : i32
    %36 = vector.broadcast %c2_i32_10 : i32 to vector<32x128xi32>
    %37 = arith.shrsi %3, %36 : vector<32x128xi32>
    %c1_i32_11 = arith.constant 1 : i32
    %38 = vector.broadcast %c1_i32_11 : i32 to vector<32x128xi32>
    %39 = arith.andi %37, %38 : vector<32x128xi32>
    %c2_i32_12 = arith.constant 2 : i32
    %40 = vector.broadcast %c2_i32_12 : i32 to vector<32x128xi32>
    %41 = arith.muli %40, %39 : vector<32x128xi32>
    %c1_i32_13 = arith.constant 1 : i32
    %42 = vector.broadcast %c1_i32_13 : i32 to vector<32x128xi32>
    %43 = arith.subi %42, %41 : vector<32x128xi32>
    %44 = arith.sitofp %43 : vector<32x128xi32> to vector<32x128xf32>
    %cst_14 = arith.constant 2.000000e+00 : f32
    %45 = vector.broadcast %cst_14 : f32 to vector<32x128xf32>
    %46 = arith.subf %45, %35 : vector<32x128xf32>
    %47 = arith.mulf %44, %46 : vector<32x128xf32>
    %cst_15 = arith.constant 0.316227764 : f32
    %48 = vector.broadcast %cst_15 : f32 to vector<32x128xf32>
    %49 = arith.mulf %47, %48 : vector<32x128xf32>
    %c0_16 = arith.constant 0 : index
    %c0_17 = arith.constant 0 : index
    %c0_18 = arith.constant 0 : index
    %50 = vector.load %arg2[%c0_16, %c0_17, %c0_18] : memref<2x32x128xf32, #tpu.memory_space<vmem>>, vector<1x32x128xf32>
    %51 = vector.shape_cast %50 : vector<1x32x128xf32> to vector<32x128xf32>
    %52 = vector.shape_cast %26 : vector<32x128xf32> to vector<1x32x128xf32>
    tpu.vector_store %arg2[%c0_16, %c0_17, %c0_18], %52 {strides = array<i32>} : memref<2x32x128xf32, #tpu.memory_space<vmem>>, vector<1x32x128xf32>,
    %c1 = arith.constant 1 : index
    %c0_19 = arith.constant 0 : index
    %c0_20 = arith.constant 0 : index
    %53 = vector.load %arg2[%c1, %c0_19, %c0_20] : memref<2x32x128xf32, #tpu.memory_space<vmem>>, vector<1x32x128xf32>
    %54 = vector.shape_cast %53 : vector<1x32x128xf32> to vector<32x128xf32>
    %55 = vector.shape_cast %49 : vector<32x128xf32> to vector<1x32x128xf32>
    tpu.vector_store %arg2[%c1, %c0_19, %c0_20], %55 {strides = array<i32>} : memref<2x32x128xf32, #tpu.memory_space<vmem>>, vector<1x32x128xf32>,
    %c0_21 = arith.constant 0 : index
    %c0_22 = arith.constant 0 : index
    %56 = vector.load %arg3[%c0_21, %c0_22] : memref<32x128xi32, #tpu.memory_space<vmem>>, vector<32x128xi32>
    tpu.vector_store %arg3[%c0_21, %c0_22], %3 {strides = array<i32>} : memref<32x128xi32, #tpu.memory_space<vmem>>, vector<32x128xi32>,
    return
  }
  func.func @transform_0(%arg0: i32) -> (i32, i32) {
    %c0_i32 = arith.constant 0 : i32
    %c0_i32_0 = arith.constant 0 : i32
    return %arg0, %c0_i32 : i32, i32
  }
  func.func @transform_1(%arg0: i32) -> (i32, i32, i32) {
    %c0_i32 = arith.constant 0 : i32
    %c0_i32_0 = arith.constant 0 : i32
    %c0_i32_1 = arith.constant 0 : i32
    return %c0_i32, %arg0, %c0_i32_0 : i32, i32, i32
  }
  func.func @transform_2(%arg0: i32) -> (i32, i32) {
    %c0_i32 = arith.constant 0 : i32
    %c0_i32_0 = arith.constant 0 : i32
    return %arg0, %c0_i32 : i32, i32
  }
}

</mosaic_0001>

<bundles_post_ra>
// kernel: tpu_custom_call.1
= control target key start
LH: loop header
LB: loop body
LE: loop exit
PB: predicated region body
PF: predicated region fallthrough
CT: control target
= control target key end

     0   :  { %8 = vsyncpa [#allocation3], 0  ;;  %s353_s0 = inlined_call_operand.hbm [shape: s8[32,128], index: 0, kind: input, shape index: {}]   ;;  %s354_s1 = inlined_call_operand.hbm [shape: f32[2,32,128], index: 1, kind: output, shape index: {0}]   ;;  %s355_s2 = inlined_call_operand.hbm [shape: s32[32,128], index: 2, kind: output, shape index: {1}]  }
   0x1   :  { %9 = vsyncpa [#allocation4], 0 }
   0x2   :  { %10 = vsyncpa [#allocation7], 0  ;;  %s256_s9 = smov [#allocation2]   ;;  %s184_s13 = scalar_lea.hbm %s353_s0, 128 }
   0x3   :  { %s17_s10 = sshll.u32 %s256_s9, 4  ;;  %p185_p0 = scmp.ne.s32.totalorder %s353_s0, %s184_s13  ;;  %s18_s10 = int_to_ptr.vmem [resolvable:$true] %s17_s10 }
   0x4   :  { %p188_p1 = scmp.lt.u32.totalorder %s184_s13, %s353_s0 }
   0x6   :  { %p190_p2 = pnand %p188_p1, %p185_p0 }
   0x8   :  { %193 = shalt.err (!%p190_p2)
}
   0x9   :  { %s194_s18 = scalar_lea.vmem %s18_s10, 128  ;;  %p199_p4 = scmp.lt.s32.totalorder %s18_s10, %s18_s10 }
   0xa   :  { %p195_p3 = scmp.ne.s32.totalorder %s18_s10, %s194_s18  ;;  %p200_p5 = scmp.lt.s32.totalorder %s194_s18, %s194_s18 }
   0xc   :  { %p201_p6 = por %p200_p5, %p199_p4 }
   0xe   :  { %p202_p7 = pnand %p201_p6, %p195_p3 }
  0x10   :  { %205 = shalt.err (!%p202_p7)
}
  0x11   :  { %20 = dma.hbm_to_vmem [thread:$0]  %s353_s0, 128, %s18_s10, [#allocation3]  }
  0x12   :  { %250 = dma.done.wait [#allocation3], 128  }
  0x13   :  { %251 = vsyncadd [#allocation3], 4294967168  ;;  %v24_v0 = vld [vmem:[#allocation2] sm:$0xff]  ;;  %s257_s21 = smov [#allocation6]  }
  0x14   :  { %s163_s22 = sshll.u32 %s257_s21, 4  ;;  %v25_v1 = vunpack.c.0.s8 %v24_v0  ;;  %v26_v2 = vunpack.c.1.s8 %v24_v0  ;;  %v27_v3 = vunpack.c.2.s8 %v24_v0  ;;  %v28_v4 = vunpack.c.3.s8 %v24_v0  ;;  %s296_s22 = int_to_ptr.vmem [resolvable:$true] %s163_s22 }
  0x15   :  { %s206_s0 = scalar_lea.vmem %s296_s22, 512  ;;  %p211_p9 = scmp.lt.s32.totalorder %s296_s22, %s296_s22 }
  0x16   :  { %v288_v5 = vand.u32 15, %v25_v1  ;;  %v290_v6 = vand.u32 15, %v26_v2  ;;  %v292_v7 = vand.u32 15, %v27_v3  ;;  %v294_v8 = vand.u32 15, %v28_v4  ;;  %p207_p8 = scmp.ne.s32.totalorder %s296_s22, %s206_s0  ;;  %p212_p10 = scmp.lt.s32.totalorder %s206_s0, %s206_s0 }
  0x18   :  { %v33_v9 = vshra.s32 %v288_v5, 1  ;;  %v53_v10 = vshra.s32 %v288_v5, 3  ;;  %142 = vst [vmem:[#allocation6] sm:$0xff] %v288_v5  ;;  %v34_v11 = vshra.s32 %v290_v6, 1  ;;  %v54_v12 = vshra.s32 %v290_v6, 3  ;;  %143 = vst [vmem:[#allocation6 + $0x8] sm:$0xff] %v290_v6  ;;  %p213_p11 = por %p212_p10, %p211_p9 }
  0x19   :  { %144 = vst [vmem:[#allocation6 + $0x10] sm:$0xff] %v292_v7  ;;  %145 = vst [vmem:[#allocation6 + $0x18] sm:$0xff] %v294_v8  ;;  %v35_v13 = vshra.s32 %v292_v7, 1  ;;  %v55_v14 = vshra.s32 %v292_v7, 3  ;;  %v36_v15 = vshra.s32 %v294_v8, 1  ;;  %v56_v16 = vshra.s32 %v294_v8, 3 }
  0x1a   :  { %p214_p12 = pnand %p213_p11, %p207_p8 }
  0x1c   :  { %217 = shalt.err (!%p214_p12)
}
  0x1d   :  { %s218_s25 = scalar_lea.hbm %s355_s2, 512 }
  0x1e   :  { %p219_p13 = scmp.ne.s32.totalorder %s355_s2, %s218_s25  ;;  %p222_p0 = scmp.lt.u32.totalorder %s218_s25, %s355_s2 }
  0x20   :  { %p224_p1 = pnand %p222_p0, %p219_p13 }
  0x22   :  { %227 = shalt.err (!%p224_p1)
}
  0x23   :  { %s258_s30 = smov 128   ;;  %s259_s3 = smov 8   ;;  %v37_v17 = vand.u32 1, %v33_v9  ;;  %v57_v18 = vand.u32 1, %v53_v10  ;;  %v38_v19 = vand.u32 1, %v34_v11  ;;  %v58_v20 = vand.u32 1, %v54_v12 }
  0x24   :  { %169 = dma.vmem_to_hbm [thread:$0]  %s296_s22, 512, %s355_s2, [#allocation7], %s258_s30, %s258_s30, %s259_s3   ;;  %v39_v21 = vand.u32 1, %v35_v13  ;;  %v59_v22 = vand.u32 1, %v55_v14  ;;  %v40_v23 = vand.u32 1, %v36_v15  ;;  %v60_v24 = vand.u32 1, %v56_v16 }
  0x25   :  { %v41_v25 = vmul.u32 2, %v37_v17  ;;  %v61_v26 = vmul.u32 2, %v57_v18  ;;  %v85_v27 = vand.u32 1, %v288_v5  ;;  %v101_v28 = vshra.s32 %v288_v5, 2  ;;  %s260_s2 = smov [#allocation5]  }
  0x26   :  { %v42_v29 = vmul.u32 2, %v38_v19  ;;  %v62_v30 = vmul.u32 2, %v58_v20  ;;  %v86_v31 = vand.u32 1, %v290_v6  ;;  %v102_v32 = vshra.s32 %v290_v6, 2  ;;  %s151_s6 = sshll.u32 %s260_s2, 4  ;;  %s152_s6 = int_to_ptr.vmem [resolvable:$true] %s151_s6 }
  0x27   :  { %v45_v33 = vsub.s32 1, %v41_v25  ;;  %v65_v34 = vsub.s32 1, %v61_v26  ;;  %v43_v35 = vmul.u32 2, %v39_v21  ;;  %v63_v36 = vmul.u32 2, %v59_v22  ;;  %s228_s7 = scalar_lea.vmem %s152_s6, 1024  ;;  %p233_p3 = scmp.lt.s32.totalorder %s152_s6, %s152_s6 }
  0x28   :  { %v46_v37 = vsub.s32 1, %v42_v29  ;;  %v66_v38 = vsub.s32 1, %v62_v30  ;;  %v44_v39 = vmul.u32 2, %v40_v23  ;;  %v64_v40 = vmul.u32 2, %v60_v24  ;;  %p229_p2 = scmp.ne.s32.totalorder %s152_s6, %s228_s7  ;;  %p234_p4 = scmp.lt.s32.totalorder %s228_s7, %s228_s7 }
  0x29   :  { %v49_v41 = vcvt.s32.f32 %v45_v33  ;;  %v69_v42 = vcvt.s32.f32 %v65_v34  ;;  %v47_v43 = vsub.s32 1, %v43_v35  ;;  %v67_v44 = vsub.s32 1, %v63_v36 }
  0x2a   :  { %v50_v45 = vcvt.s32.f32 %v46_v37  ;;  %v70_v46 = vcvt.s32.f32 %v66_v38  ;;  %v48_v47 = vsub.s32 1, %v44_v39  ;;  %v68_v48 = vsub.s32 1, %v64_v40  ;;  %p235_p5 = por %p234_p4, %p233_p3 }
  0x2b   :  { %v73_v49 = vsub.f32 2.0, %v49_v41  ;;  %v51_v50 = vcvt.s32.f32 %v47_v43  ;;  %v71_v51 = vcvt.s32.f32 %v67_v44  ;;  %v89_v52 = vmul.u32 2, %v85_v27 }
  0x2c   :  { %v74_v53 = vsub.f32 2.0, %v50_v45  ;;  %v52_v54 = vcvt.s32.f32 %v48_v47  ;;  %v72_v55 = vcvt.s32.f32 %v68_v48  ;;  %v105_v56 = vand.u32 1, %v101_v28  ;;  %p236_p6 = pnand %p235_p5, %p229_p2 }
  0x2d   :  { %v77_v57 = vmul.f32 %v73_v49, %v69_v42  ;;  %v75_v58 = vsub.f32 2.0, %v51_v50  ;;  %v93_v59 = vsub.s32 1, %v89_v52  ;;  %v90_v60 = vmul.u32 2, %v86_v31 }
  0x2e   :  { %v78_v61 = vmul.f32 %v74_v53, %v70_v46  ;;  %v76_v62 = vsub.f32 2.0, %v52_v54  ;;  %v109_v63 = vmul.u32 2, %v105_v56  ;;  %v106_v0 = vand.u32 1, %v102_v32 }
  0x2f   :  { %v81_v1 = vmul.f32 0.31622776, %v77_v57  ;;  %v79_v2 = vmul.f32 %v75_v58, %v71_v51  ;;  %v97_v3 = vcvt.s32.f32 %v93_v59  ;;  %v94_v4 = vsub.s32 1, %v90_v60 }
  0x30   :  { %v82_v5 = vmul.f32 0.31622776, %v78_v61  ;;  %v80_v6 = vmul.f32 %v76_v62, %v72_v55  ;;  %v113_v9 = vsub.s32 1, %v109_v63  ;;  %v110_v10 = vmul.u32 2, %v106_v0 }
  0x31   :  { %133 = vst [vmem:[#allocation5] sm:$0xff] %v81_v1  ;;  %v83_v11 = vmul.f32 0.31622776, %v79_v2  ;;  %v121_v12 = vsub.f32 2.0, %v97_v3  ;;  %v98_v13 = vcvt.s32.f32 %v94_v4  ;;  %v87_v14 = vand.u32 1, %v292_v7 }
  0x32   :  { %134 = vst [vmem:[#allocation5 + $0x8] sm:$0xff] %v82_v5  ;;  %v84_v15 = vmul.f32 0.31622776, %v80_v6  ;;  %v117_v16 = vcvt.s32.f32 %v113_v9  ;;  %v114_v17 = vsub.s32 1, %v110_v10  ;;  %v103_v18 = vshra.s32 %v292_v7, 2 }
  0x33   :  { %135 = vst [vmem:[#allocation5 + $0x10] sm:$0xff] %v83_v11  ;;  %v122_v19 = vsub.f32 2.0, %v98_v13  ;;  %v91_v20 = vmul.u32 2, %v87_v14  ;;  %v88_v21 = vand.u32 1, %v294_v8  ;;  %v104_v22 = vshra.s32 %v294_v8, 2 }
  0x34   :  { %136 = vst [vmem:[#allocation5 + $0x18] sm:$0xff] %v84_v15  ;;  %v125_v23 = vmul.f32 %v121_v12, %v117_v16  ;;  %v118_v24 = vcvt.s32.f32 %v114_v17  ;;  %v107_v25 = vand.u32 1, %v103_v18 }
  0x35   :  { %v95_v26 = vsub.s32 1, %v91_v20  ;;  %v92_v27 = vmul.u32 2, %v88_v21  ;;  %v108_v28 = vand.u32 1, %v104_v22 }
  0x36   :  { %v129_v29 = vmul.f32 0.31622776, %v125_v23  ;;  %v126_v30 = vmul.f32 %v122_v19, %v118_v24  ;;  %v111_v31 = vmul.u32 2, %v107_v25 }
  0x37   :  { %v99_v32 = vcvt.s32.f32 %v95_v26  ;;  %v96_v33 = vsub.s32 1, %v92_v27  ;;  %v112_v7 = vmul.u32 2, %v108_v28 }
  0x38   :  { %138 = vst [vmem:[#allocation5 + $0x20] sm:$0xff] %v129_v29  ;;  %v130_v34 = vmul.f32 0.31622776, %v126_v30  ;;  %v115_v35 = vsub.s32 1, %v111_v31 }
  0x39   :  { %v123_v36 = vsub.f32 2.0, %v99_v32  ;;  %v100_v37 = vcvt.s32.f32 %v96_v33  ;;  %v116_v38 = vsub.s32 1, %v112_v7 }
  0x3a   :  { %139 = vst [vmem:[#allocation5 + $0x28] sm:$0xff] %v130_v34  ;;  %v119_v8 = vcvt.s32.f32 %v115_v35 }
  0x3b   :  { %v120_v39 = vcvt.s32.f32 %v116_v38  ;;  %v124_v40 = vsub.f32 2.0, %v100_v37 }
  0x3c   :  { %v127_v41 = vmul.f32 %v123_v36, %v119_v8 }
  0x3d   :  { %v128_v42 = vmul.f32 %v124_v40, %v120_v39 }
  0x3e   :  { %v131_v43 = vmul.f32 0.31622776, %v127_v41 }
  0x3f   :  { %v132_v44 = vmul.f32 0.31622776, %v128_v42 }
  0x40   :  { %140 = vst [vmem:[#allocation5 + $0x30] sm:$0xff] %v131_v43 }
  0x41   :  { %141 = vst [vmem:[#allocation5 + $0x38] sm:$0xff] %v132_v44 }
  0x42   :  { %239 = shalt.err (!%p236_p6)
}
  0x43   :  { %s240_s10 = scalar_lea.hbm %s354_s1, 1024 }
  0x44   :  { %p241_p7 = scmp.ne.s32.totalorder %s354_s1, %s240_s10  ;;  %p244_p8 = scmp.lt.u32.totalorder %s240_s10, %s354_s1 }
  0x46   :  { %p246_p9 = pnand %p244_p8, %p241_p7 }
  0x48   :  { %249 = shalt.err (!%p246_p9)
}
  0x49   :  { %157 = dma.vmem_to_hbm [thread:$0]  %s152_s6, 1024, %s354_s1, [#allocation4], %s258_s30, %s258_s30, %s259_s3  }
  0x4a   :  { %252 = dma.done.wait [#allocation4], 1024  }
  0x4b   :  { %253 = vsyncadd [#allocation4], 4294966272 }
  0x4c   :  { %254 = dma.done.wait [#allocation7], 512  }
  0x4d   :  { %255 = vsyncadd [#allocation7], 4294966784 }
  0x4e   :  { %176 = vsyncpa [#allocation3], 1 }
  0x4f   :  { %177 = vsyncpa [#allocation4], 1 }
  0x50   :  { %178 = vsyncpa [#allocation7], 1 }

</bundles_post_ra>
